<compile_context>
chip_gen: v6e
topology: v6e:2x2x1
jax: 0.10.0
libtpu: 0.0.40
codegen_flags: <defaults>
</compile_context>

<pallas_src>
import functools

import jax
import jax.numpy as jnp
from jax import lax
from jax.experimental import pallas as pl
from jax.experimental.pallas import tpu as pltpu


def _pick_query_tile(n, target=256):
    """Largest divisor of n that is <= target (query-tile rows)."""
    if n <= target:
        return n
    for t in range(target, 0, -1):
        if n % t == 0:
            return t
    return n


def mha_kernel(x_ref, wqkv_ref, bqkv_ref, wo_ref, bo_ref,
               out_ref, probs_ref,
               q_s, k_s, v_s, acc_ref, *, scale, hd, tq):
    """One grid step == one (batch, head, query-tile) triple.

    x_ref:     (1, N, E)        activation dtype
    wqkv_ref:  (1, E, 3*hd)     head-major fused QKV weight
    bqkv_ref:  (1, 1, 3*hd)     f32 fused QKV bias
    wo_ref:    (1, hd, E)       head-major slice of the out projection
    bo_ref:    (1, E)           f32 out-proj bias
    out_ref:   (1, tq, E)       output tile (accumulated over the head axis)
    probs_ref: (1, 1, tq, N)    attention probabilities tile
    q_s/k_s/v_s: (N, hd)        activation-dtype VMEM scratch (per head)
    acc_ref:   (N, E) f32       out-projection accumulator (per batch)
    """
    h = pl.program_id(1)
    qi = pl.program_id(2)
    in_dtype = x_ref.dtype

    # --- fused QKV projection, once per (batch, head) -----------------------
    @pl.when(qi == 0)
    def _():
        x = x_ref[0]                                               # (N, E)
        qkv = jnp.dot(x, wqkv_ref[0],
                      preferred_element_type=jnp.float32) + bqkv_ref[0]
        # Scale Q in f32 (exact), then cast to the activation dtype so the
        # scores / PV matmuls take the fast MXU path for bf16 inputs.
        q_s[...] = (qkv[:, :hd] * scale).astype(in_dtype)
        k_s[...] = qkv[:, hd:2 * hd].astype(in_dtype)
        v_s[...] = qkv[:, 2 * hd:].astype(in_dtype)

    row0 = pl.multiple_of(qi * tq, tq)
    q = q_s[pl.ds(row0, tq), :]                                    # (tq, hd)
    k = k_s[...]                                                   # (N, hd)
    v = v_s[...]                                                   # (N, hd)

    # scores = q @ k^T without materializing a transpose (contract last dims).
    scores = lax.dot_general(q, k, (((1,), (1,)), ((), ())),
                             preferred_element_type=jnp.float32)   # (tq, N)

    # --- softmax (f32) -------------------------------------------------------
    m = jnp.max(scores, axis=-1, keepdims=True)
    e = jnp.exp(scores - m)
    # approx=True would use the EUP but loosens the probs tolerance; keep exact.
    probs = e * pl.reciprocal(jnp.sum(e, axis=-1, keepdims=True), approx=False)

    probs_ref[0, 0] = probs.astype(probs_ref.dtype)

    # --- attention output + this head's slice of the out projection ----------
    pv = jnp.dot(probs.astype(in_dtype), v,
                 preferred_element_type=jnp.float32)               # (tq, hd)
    contrib = jnp.dot(pv.astype(in_dtype), wo_ref[0],
                      preferred_element_type=jnp.float32)          # (tq, E)

    @pl.when(h == 0)
    def _():
        acc_ref[pl.ds(row0, tq), :] = bo_ref[...] + contrib

    @pl.when(h != 0)
    def _():
        acc_ref[pl.ds(row0, tq), :] = acc_ref[pl.ds(row0, tq), :] + contrib

    # Write the running accumulation every step; the last head's write wins.
    out_ref[0] = acc_ref[pl.ds(row0, tq), :].astype(out_ref.dtype)


def prepare_params(w_qkv, b_qkv, w_out, b_out, num_heads, dtype):
    """One-time head-major repack of the nn.Linear parameters (hoisted out of
    the per-call path)."""
    three_e, E = w_qkv.shape
    assert three_e == 3 * E
    hd = E // num_heads
    assert hd * num_heads == E, "embed_dim must be divisible by num_heads"
    f32 = jnp.float32

    # nn.Linear convention: y = x @ W.T + b with W of shape (out, in).
    wq = w_qkv[:E].reshape(num_heads, hd, E)
    wk = w_qkv[E:2 * E].reshape(num_heads, hd, E)
    wv = w_qkv[2 * E:].reshape(num_heads, hd, E)
    # Fused per-head (E, 3*hd) weight: wider MXU output lanes per pass.
    wqkv = jnp.concatenate([wq, wk, wv], axis=1).transpose(0, 2, 1).astype(dtype)

    bq = b_qkv[:E].reshape(num_heads, hd)
    bk = b_qkv[E:2 * E].reshape(num_heads, hd)
    bv = b_qkv[2 * E:].reshape(num_heads, hd)
    bqkv = jnp.concatenate([bq, bk, bv], axis=1).reshape(num_heads, 1, 3 * hd).astype(f32)

    # out = concat_heads @ W_out.T + b_out == sum_h pv_h @ Wo[h] + b_out
    wo = w_out.reshape(E, num_heads, hd).transpose(1, 2, 0).astype(dtype)  # (H, hd, E)
    bo = b_out.reshape(1, E).astype(f32)
    return wqkv, bqkv, wo, bo


def custom_mha(x, wqkv, bqkv, wo, bo):
    """attn_mask=None path of CustomMultiHeadAttention.forward (eval mode)."""
    B, N, E = x.shape
    H = wqkv.shape[0]
    hd = wqkv.shape[2] // 3
    dt = x.dtype
    scale = float(hd) ** -0.5

    tq = _pick_query_tile(N)
    nq = N // tq

    kern = functools.partial(mha_kernel, scale=scale, hd=hd, tq=tq)

    # Explicit VMEM budget from the actual block set (double-buffered inputs /
    # outputs) + scratches, with headroom; never rely on the default limit.
    dsz = jnp.dtype(dt).itemsize
    block_bytes = 2 * (N * E * dsz           # x
                       + E * 3 * hd * dsz    # wqkv
                       + 3 * hd * 4          # bqkv
                       + hd * E * dsz        # wo
                       + E * 4               # bo
                       + tq * E * dsz        # out
                       + tq * N * dsz)       # probs
    scratch_bytes = 3 * N * hd * dsz + N * E * 4
    vmem_limit = max(int(1.5 * (block_bytes + scratch_bytes)) + (1 << 20), 16 << 20)
    vmem_limit = min(vmem_limit, 100 << 20)

    out, probs = pl.pallas_call(
        kern,
        out_shape=(
            jax.ShapeDtypeStruct((B, N, E), dt),
            jax.ShapeDtypeStruct((B, H, N, N), dt),
        ),
        grid=(B, H, nq),
        in_specs=[
            pl.BlockSpec((1, N, E), lambda b, h, q: (b, 0, 0)),        # x (const over h, q)
            pl.BlockSpec((1, E, 3 * hd), lambda b, h, q: (h, 0, 0)),   # Wqkv
            pl.BlockSpec((1, 1, 3 * hd), lambda b, h, q: (h, 0, 0)),   # bqkv
            pl.BlockSpec((1, hd, E), lambda b, h, q: (h, 0, 0)),       # Wout head slice
            pl.BlockSpec((1, E), lambda b, h, q: (0, 0)),              # b_out
        ],
        out_specs=(
            pl.BlockSpec((1, tq, E), lambda b, h, q: (b, q, 0)),       # out
            pl.BlockSpec((1, 1, tq, N), lambda b, h, q: (b, h, q, 0)), # attn_probs
        ),
        scratch_shapes=[
            pltpu.VMEM((N, hd), dt),          # Q (scaled)
            pltpu.VMEM((N, hd), dt),          # K
            pltpu.VMEM((N, hd), dt),          # V
            pltpu.VMEM((N, E), jnp.float32),  # out-projection accumulator
        ],
        compiler_params=pltpu.CompilerParams(
            dimension_semantics=("parallel", "arbitrary", "arbitrary"),
            vmem_limit_bytes=vmem_limit),
    )(x, wqkv, bqkv, wo, bo)
    return out, probs


def ref_mha(x, w_qkv, b_qkv, w_out, b_out, num_heads):
    """Pure-JAX reference matching the PyTorch forward (eval mode, no mask)."""
    B, N, E = x.shape
    hd = E // num_heads
    qkv = x @ w_qkv.T + b_qkv
    qkv = qkv.reshape(B, N, 3, num_heads, hd).transpose(2, 0, 3, 1, 4)
    q, k, v = qkv[0], qkv[1], qkv[2]
    scores = jnp.einsum('bhnd,bhmd->bhnm', q, k) * hd ** -0.5
    probs = jax.nn.softmax(scores, axis=-1)
    out = jnp.einsum('bhnm,bhmd->bhnd', probs, v)
    out = out.transpose(0, 2, 1, 3).reshape(B, N, E)
    return out @ w_out.T + b_out, probs


def _run_case(key, B, N, E, H, dtype=jnp.float32):
    kx, kw1, kb1, kw2, kb2 = jax.random.split(key, 5)
    x = jax.random.normal(kx, (B, N, E), dtype=dtype)
    w_qkv = jax.random.normal(kw1, (3 * E, E), dtype=jnp.float32) * 0.05
    b_qkv = jax.random.normal(kb1, (3 * E,), dtype=jnp.float32) * 0.05
    w_out = jax.random.normal(kw2, (E, E), dtype=jnp.float32) * 0.05
    b_out = jax.random.normal(kb2, (E,), dtype=jnp.float32) * 0.05

    params = prepare_params(w_qkv, b_qkv, w_out, b_out, H, dtype)  # hoisted repack
    mha = jax.jit(custom_mha)
    out, probs = mha(x, *params)
    out = jax.block_until_ready(out)
    probs = jax.block_until_ready(probs)

    out_ref, probs_ref = ref_mha(x, w_qkv, b_qkv, w_out, b_out, H)
    assert out.shape == (B, N, E) and probs.shape == (B, H, N, N)
    assert jnp.allclose(out, out_ref, atol=1e-4, rtol=1e-4)
    assert jnp.allclose(probs, probs_ref, atol=1e-5, rtol=1e-4)


if __name__ == "__main__":
    key = jax.random.PRNGKey(0)
    k1, k2 = jax.random.split(key)

    # Small shape consistent with the module: batch=2, seq=8, embed_dim=32, heads=4.
    _run_case(k1, B=2, N=8, E=32, H=4)
    # Slightly larger case that exercises the query-tile axis (nq = 2).
    _run_case(k2, B=1, N=512, E=32, H=4)

    print("KERNEL_OK")
</pallas_src>

<mosaic_0001>
module attributes {stable_mosaic.version = 11 : i64} {
  func.func @mha_kernel(%arg0: i32, %arg1: i32, %arg2: i32, %arg3: memref<1x8x32xf32, #tpu.memory_space<vmem>>, %arg4: memref<1x32x24xf32, #tpu.memory_space<vmem>>, %arg5: memref<1x1x24xf32, #tpu.memory_space<vmem>>, %arg6: memref<1x8x32xf32, #tpu.memory_space<vmem>>, %arg7: memref<1x32xf32, #tpu.memory_space<vmem>>, %arg8: memref<1x8x32xf32, #tpu.memory_space<vmem>>, %arg9: memref<1x1x8x8xf32, #tpu.memory_space<vmem>>, %arg10: memref<8x8xf32, #tpu.memory_space<vmem>>, %arg11: memref<8x8xf32, #tpu.memory_space<vmem>>, %arg12: memref<8x8xf32, #tpu.memory_space<vmem>>, %arg13: memref<8x32xf32, #tpu.memory_space<vmem>>) attributes {dimension_semantics = [#tpu.dimension_semantics<parallel>, #tpu.dimension_semantics<arbitrary>, #tpu.dimension_semantics<arbitrary>], iteration_bounds = array<i64: 2, 4, 1>, scalar_prefetch = 0 : i64, scratch_operands = 4 : i64, tpu.core_type = #tpu.core_type<tc>, window_params = [{transform_indices = @transform_0, window_bounds = array<i64: 1, 8, 32>}, {transform_indices = @transform_1, window_bounds = array<i64: 1, 32, 24>}, {transform_indices = @transform_2, window_bounds = array<i64: 1, 1, 24>}, {transform_indices = @transform_3, window_bounds = array<i64: 1, 8, 32>}, {pipeline_mode = #tpu.pipeline_mode<synchronous>, transform_indices = @transform_4, window_bounds = array<i64: 1, 32>}, {transform_indices = @transform_5, window_bounds = array<i64: 1, 8, 32>}, {transform_indices = @transform_6, window_bounds = array<i64: 1, 1, 8, 8>}]} {
    %c0_i32 = arith.constant 0 : i32
    %0 = arith.cmpi eq, %arg2, %c0_i32 : i32
    %1 = arith.extui %0 : i1 to i32
    %c0_i32_0 = arith.constant 0 : i32
    %2 = arith.cmpi ne, %1, %c0_i32_0 : i32
    scf.if %2 {
      %c0_24 = arith.constant 0 : index
      %c0_25 = arith.constant 0 : index
      %c0_26 = arith.constant 0 : index
      %38 = vector.load %arg3[%c0_24, %c0_25, %c0_26] : memref<1x8x32xf32, #tpu.memory_space<vmem>>, vector<1x8x32xf32>
      %39 = vector.shape_cast %38 : vector<1x8x32xf32> to vector<8x32xf32>
      %c0_27 = arith.constant 0 : index
      %c0_28 = arith.constant 0 : index
      %c0_29 = arith.constant 0 : index
      %40 = vector.load %arg4[%c0_27, %c0_28, %c0_29] : memref<1x32x24xf32, #tpu.memory_space<vmem>>, vector<1x32x24xf32>
      %41 = vector.shape_cast %40 : vector<1x32x24xf32> to vector<32x24xf32>
      %cst_30 = arith.constant dense<0.000000e+00> : vector<8x24xf32>
      %42 = tpu.matmul %39, %41, %cst_30 {dimension_numbers = #tpu.dot_dimension_numbers<[1], [0], [0], [1], [0, 0, 1, 1], [], []>} : vector<8x32xf32>, vector<32x24xf32>, vector<8x24xf32> -> vector<8x24xf32>
      %c0_31 = arith.constant 0 : index
      %c0_32 = arith.constant 0 : index
      %c0_33 = arith.constant 0 : index
      %43 = vector.load %arg5[%c0_31, %c0_32, %c0_33] : memref<1x1x24xf32, #tpu.memory_space<vmem>>, vector<1x1x24xf32>
      %44 = vector.shape_cast %43 : vector<1x1x24xf32> to vector<1x24xf32>
      %45 = vector.broadcast %44 : vector<1x24xf32> to vector<8x24xf32>
      %46 = arith.addf %42, %45 : vector<8x24xf32>
      %47 = vector.extract_strided_slice %46 {offsets = [0, 0], sizes = [8, 8], strides = [1, 1]} : vector<8x24xf32> to vector<8x8xf32>
      %cst_34 = arith.constant 0.353553385 : f32
      %48 = vector.broadcast %cst_34 : f32 to vector<8x8xf32>
      %49 = arith.mulf %47, %48 : vector<8x8xf32>
      %c0_35 = arith.constant 0 : index
      %c0_36 = arith.constant 0 : index
      %50 = vector.load %arg10[%c0_35, %c0_36] : memref<8x8xf32, #tpu.memory_space<vmem>>, vector<8x8xf32>
      tpu.vector_store %arg10[%c0_35, %c0_36], %49 {strides = array<i32>} : memref<8x8xf32, #tpu.memory_space<vmem>>, vector<8x8xf32>,
      %51 = vector.extract_strided_slice %46 {offsets = [0, 8], sizes = [8, 8], strides = [1, 1]} : vector<8x24xf32> to vector<8x8xf32>
      %c0_37 = arith.constant 0 : index
      %c0_38 = arith.constant 0 : index
      %52 = vector.load %arg11[%c0_37, %c0_38] : memref<8x8xf32, #tpu.memory_space<vmem>>, vector<8x8xf32>
      tpu.vector_store %arg11[%c0_37, %c0_38], %51 {strides = array<i32>} : memref<8x8xf32, #tpu.memory_space<vmem>>, vector<8x8xf32>,
      %53 = vector.extract_strided_slice %46 {offsets = [0, 16], sizes = [8, 8], strides = [1, 1]} : vector<8x24xf32> to vector<8x8xf32>
      %c0_39 = arith.constant 0 : index
      %c0_40 = arith.constant 0 : index
      %54 = vector.load %arg12[%c0_39, %c0_40] : memref<8x8xf32, #tpu.memory_space<vmem>>, vector<8x8xf32>
      tpu.vector_store %arg12[%c0_39, %c0_40], %53 {strides = array<i32>} : memref<8x8xf32, #tpu.memory_space<vmem>>, vector<8x8xf32>,
    } else {
    }
    %c8_i32 = arith.constant 8 : i32
    %3 = arith.muli %arg2, %c8_i32 : i32
    %4 = tpu.assume_multiple %3, 8 : i32
    %5 = arith.index_cast %4 : i32 to index
    %c0 = arith.constant 0 : index
    %6 = vector.load %arg10[%5, %c0] : memref<8x8xf32, #tpu.memory_space<vmem>>, vector<8x8xf32>
    %c0_1 = arith.constant 0 : index
    %c0_2 = arith.constant 0 : index
    %7 = vector.load %arg11[%c0_1, %c0_2] : memref<8x8xf32, #tpu.memory_space<vmem>>, vector<8x8xf32>
    %c0_3 = arith.constant 0 : index
    %c0_4 = arith.constant 0 : index
    %8 = vector.load %arg12[%c0_3, %c0_4] : memref<8x8xf32, #tpu.memory_space<vmem>>, vector<8x8xf32>
    %cst = arith.constant dense<0.000000e+00> : vector<8x8xf32>
    %9 = tpu.matmul %6, %7, %cst {dimension_numbers = #tpu.dot_dimension_numbers<[1], [1], [0], [0], [0, 0, 1, 0], [], []>} : vector<8x8xf32>, vector<8x8xf32>, vector<8x8xf32> -> vector<8x8xf32>
    %cst_5 = arith.constant dense<0xFF800000> : vector<8xf32>
    %10 = vector.multi_reduction <maximumf>, %9, %cst_5 [1] : vector<8x8xf32> to vector<8xf32>
    %11 = vector.shape_cast %10 : vector<8xf32> to vector<8x1xf32>
    %12 = vector.broadcast %11 : vector<8x1xf32> to vector<8x8xf32>
    %13 = arith.subf %9, %12 : vector<8x8xf32>
    %14 = math.exp %13 : vector<8x8xf32>
    %cst_6 = arith.constant dense<0.000000e+00> : vector<8xf32>
    %15 = vector.multi_reduction <add>, %14, %cst_6 [1] : vector<8x8xf32> to vector<8xf32>
    %16 = vector.shape_cast %15 : vector<8xf32> to vector<8x1xf32>
    %17 = tpu.reciprocal %16 : vector<8x1xf32> -> vector<8x1xf32>
    %18 = vector.broadcast %17 : vector<8x1xf32> to vector<8x8xf32>
    %19 = arith.mulf %14, %18 : vector<8x8xf32>
    %c0_7 = arith.constant 0 : index
    %c0_8 = arith.constant 0 : index
    %c0_9 = arith.constant 0 : index
    %c0_10 = arith.constant 0 : index
    %20 = vector.load %arg9[%c0_7, %c0_8, %c0_9, %c0_10] : memref<1x1x8x8xf32, #tpu.memory_space<vmem>>, vector<1x1x8x8xf32>
    %21 = vector.shape_cast %20 : vector<1x1x8x8xf32> to vector<8x8xf32>
    %22 = vector.shape_cast %19 : vector<8x8xf32> to vector<1x1x8x8xf32>
    tpu.vector_store %arg9[%c0_7, %c0_8, %c0_9, %c0_10], %22 {strides = array<i32>} : memref<1x1x8x8xf32, #tpu.memory_space<vmem>>, vector<1x1x8x8xf32>,
    %cst_11 = arith.constant dense<0.000000e+00> : vector<8x8xf32>
    %23 = tpu.matmul %19, %8, %cst_11 {dimension_numbers = #tpu.dot_dimension_numbers<[1], [0], [0], [1], [0, 0, 1, 1], [], []>} : vector<8x8xf32>, vector<8x8xf32>, vector<8x8xf32> -> vector<8x8xf32>
    %c0_12 = arith.constant 0 : index
    %c0_13 = arith.constant 0 : index
    %c0_14 = arith.constant 0 : index
    %24 = vector.load %arg6[%c0_12, %c0_13, %c0_14] : memref<1x8x32xf32, #tpu.memory_space<vmem>>, vector<1x8x32xf32>
    %25 = vector.shape_cast %24 : vector<1x8x32xf32> to vector<8x32xf32>
    %cst_15 = arith.constant dense<0.000000e+00> : vector<8x32xf32>
    %26 = tpu.matmul %23, %25, %cst_15 {dimension_numbers = #tpu.dot_dimension_numbers<[1], [0], [0], [1], [0, 0, 1, 1], [], []>} : vector<8x8xf32>, vector<8x32xf32>, vector<8x32xf32> -> vector<8x32xf32>
    %c0_i32_16 = arith.constant 0 : i32
    %27 = arith.cmpi eq, %arg1, %c0_i32_16 : i32
    %28 = arith.extui %27 : i1 to i32
    %c0_i32_17 = arith.constant 0 : i32
    %29 = arith.cmpi ne, %28, %c0_i32_17 : i32
    scf.if %29 {
      %c0_24 = arith.constant 0 : index
      %c0_25 = arith.constant 0 : index
      %38 = vector.load %arg7[%c0_24, %c0_25] : memref<1x32xf32, #tpu.memory_space<vmem>>, vector<1x32xf32>
      %39 = vector.broadcast %38 : vector<1x32xf32> to vector<8x32xf32>
      %40 = arith.addf %39, %26 : vector<8x32xf32>
      %41 = arith.index_cast %4 : i32 to index
      %c0_26 = arith.constant 0 : index
      %42 = vector.load %arg13[%41, %c0_26] : memref<8x32xf32, #tpu.memory_space<vmem>>, vector<8x32xf32>
      tpu.vector_store %arg13[%41, %c0_26], %40 {strides = array<i32>} : memref<8x32xf32, #tpu.memory_space<vmem>>, vector<8x32xf32>,
    } else {
    }
    %c0_i32_18 = arith.constant 0 : i32
    %30 = arith.cmpi ne, %arg1, %c0_i32_18 : i32
    %31 = arith.extui %30 : i1 to i32
    %c0_i32_19 = arith.constant 0 : i32
    %32 = arith.cmpi ne, %31, %c0_i32_19 : i32
    scf.if %32 {
      %38 = arith.index_cast %4 : i32 to index
      %c0_24 = arith.constant 0 : index
      %39 = vector.load %arg13[%38, %c0_24] : memref<8x32xf32, #tpu.memory_space<vmem>>, vector<8x32xf32>
      %40 = arith.addf %39, %26 : vector<8x32xf32>
      %41 = arith.index_cast %4 : i32 to index
      %c0_25 = arith.constant 0 : index
      %42 = vector.load %arg13[%41, %c0_25] : memref<8x32xf32, #tpu.memory_space<vmem>>, vector<8x32xf32>
      tpu.vector_store %arg13[%41, %c0_25], %40 {strides = array<i32>} : memref<8x32xf32, #tpu.memory_space<vmem>>, vector<8x32xf32>,
    } else {
    }
    %33 = arith.index_cast %4 : i32 to index
    %c0_20 = arith.constant 0 : index
    %34 = vector.load %arg13[%33, %c0_20] : memref<8x32xf32, #tpu.memory_space<vmem>>, vector<8x32xf32>
    %c0_21 = arith.constant 0 : index
    %c0_22 = arith.constant 0 : index
    %c0_23 = arith.constant 0 : index
    %35 = vector.load %arg8[%c0_21, %c0_22, %c0_23] : memref<1x8x32xf32, #tpu.memory_space<vmem>>, vector<1x8x32xf32>
    %36 = vector.shape_cast %35 : vector<1x8x32xf32> to vector<8x32xf32>
    %37 = vector.shape_cast %34 : vector<8x32xf32> to vector<1x8x32xf32>
    tpu.vector_store %arg8[%c0_21, %c0_22, %c0_23], %37 {strides = array<i32>} : memref<1x8x32xf32, #tpu.memory_space<vmem>>, vector<1x8x32xf32>,
    return
  }
  func.func @transform_0(%arg0: i32, %arg1: i32, %arg2: i32) -> (i32, i32, i32) {
    %c0_i32 = arith.constant 0 : i32
    %c0_i32_0 = arith.constant 0 : i32
    %c0_i32_1 = arith.constant 0 : i32
    return %arg0, %c0_i32, %c0_i32_0 : i32, i32, i32
  }
  func.func @transform_1(%arg0: i32, %arg1: i32, %arg2: i32) -> (i32, i32, i32) {
    %c0_i32 = arith.constant 0 : i32
    %c0_i32_0 = arith.constant 0 : i32
    %c0_i32_1 = arith.constant 0 : i32
    return %arg1, %c0_i32, %c0_i32_0 : i32, i32, i32
  }
  func.func @transform_2(%arg0: i32, %arg1: i32, %arg2: i32) -> (i32, i32, i32) {
    %c0_i32 = arith.constant 0 : i32
    %c0_i32_0 = arith.constant 0 : i32
    %c0_i32_1 = arith.constant 0 : i32
    return %arg1, %c0_i32, %c0_i32_0 : i32, i32, i32
  }
  func.func @transform_3(%arg0: i32, %arg1: i32, %arg2: i32) -> (i32, i32, i32) {
    %c0_i32 = arith.constant 0 : i32
    %c0_i32_0 = arith.constant 0 : i32
    %c0_i32_1 = arith.constant 0 : i32
    return %arg1, %c0_i32, %c0_i32_0 : i32, i32, i32
  }
  func.func @transform_4(%arg0: i32, %arg1: i32, %arg2: i32) -> (i32, i32) {
    %c0_i32 = arith.constant 0 : i32
    %c0_i32_0 = arith.constant 0 : i32
    %c0_i32_1 = arith.constant 0 : i32
    return %c0_i32, %c0_i32_0 : i32, i32
  }
  func.func @transform_5(%arg0: i32, %arg1: i32, %arg2: i32) -> (i32, i32, i32) {
    %c0_i32 = arith.constant 0 : i32
    %c0_i32_0 = arith.constant 0 : i32
    return %arg0, %arg2, %c0_i32 : i32, i32, i32
  }
  func.func @transform_6(%arg0: i32, %arg1: i32, %arg2: i32) -> (i32, i32, i32, i32) {
    %c0_i32 = arith.constant 0 : i32
    %c0_i32_0 = arith.constant 0 : i32
    return %arg0, %arg1, %arg2, %c0_i32 : i32, i32, i32, i32
  }
}

</mosaic_0001>

<bundles_post_ra>
// kernel: custom_mha.1
= control target key start
LH: loop header
LB: loop body
LE: loop exit
PB: predicated region body
PF: predicated region fallthrough
CT: control target
= control target key end

     0   :  { %s1508_s0 = inlined_call_operand.vmem [shape: f32[2,8,32], index: 0, kind: input, shape index: {}]   ;;  %s1509_s1 = inlined_call_operand.vmem [shape: f32[4,32,24], index: 1, kind: input, shape index: {}]   ;;  %s1510_s2 = inlined_call_operand.vmem [shape: f32[4,1,24], index: 2, kind: input, shape index: {}]   ;;  %s1511_s3 = inlined_call_operand.vmem [shape: f32[4,8,32], index: 3, kind: input, shape index: {}]   ;;  %s1512_s4 = inlined_call_operand.vmem [shape: f32[1,32], index: 4, kind: input, shape index: {}]   ;;  %s1513_s5 = inlined_call_operand.hbm [shape: f32[2,8,32], index: 5, kind: output, shape index: {0}]   ;;  %s1514_s6 = inlined_call_operand.hbm [shape: f32[2,4,8,8], index: 6, kind: output, shape index: {1}]  }
   0x1   :  { %1523 = sst [smem:[#allocation18_spill]] %s1508_s0 }
   0x2   :  { %1524 = sst [smem:[#allocation19_spill]] %s1509_s1 }
   0x3   :  { %1525 = sst [smem:[#allocation20_spill]] %s1510_s2 }
   0x4   :  { %1526 = sst [smem:[#allocation21_spill]] %s1511_s3 }
   0x5   :  { %1527 = sst [smem:[#allocation22_spill]] %s1512_s4 }
   0x6   :  { %12 = vsyncpa [#allocation7], 0 }
   0x7   :  { %14 = vsyncpa [#allocation7 + $0x1], 0 }
   0x8   :  { %15 = vsyncpa [#allocation9], 0 }
   0x9   :  { %17 = vsyncpa [#allocation9 + $0x1], 0  ;;  %s1253_s21 = smov 0   ;;  %s1255_s22 = smov 0  }
   0xa   :  { %s1257_s23 = smov 0   ;;  %s1259_s24 = smov 0  }
   0xb   :  { %s1261_s25 = smov 0   ;;  %s1263_s26 = smov 0  }
   0xc   :  { %s1265_s27 = smov 0   ;;  %s1267_s28 = smov 0  }
   0xd   :  { %s1269_s29 = smov 0   ;;  %s1271_s30 = smov 0  }
   0xe   :  { %s1273_s7 = smov 0  }
   0xf LB: > { %1528 = sst [smem:[#allocation12_spill]] %s1190_s26  ;;  %s891_s8 = sadd.s32 4294967295, %s1210_s7   ;;  %s1210_s7 = sphi %s1273_s7, %s23_s7   ;;  %s1206_s30 = sphi %s1271_s30, %s1555_s30   ;;  %s1202_s29 = sphi %s1269_s29, %s1554_s29   ;;  %s1198_s28 = sphi %s1267_s28, %s1553_s28   ;;  %s1194_s27 = sphi %s1265_s27, %s1552_s27   ;;  %s1190_s26 = sphi %s1263_s26, %s1551_s26   ;;  %s1186_s25 = sphi %s1261_s25, %s1560_s25   ;;  %s1182_s24 = sphi %s1259_s24, %s1559_s24   ;;  %s1178_s23 = sphi %s1257_s23, %s1558_s23   ;;  %s1174_s22 = sphi %s1255_s22, %s1557_s22   ;;  %s1170_s21 = sphi %s1253_s21, %s1556_s21  }
  0x10   : > { %1529 = sst [smem:[#allocation13_spill]] %s1202_s29  ;;  %s892_s9 = sadd.s32 4294967294, %s1210_s7  }
  0x11   : > { %1530 = sst [smem:[#allocation14_spill]] %s1206_s30  ;;  %s38_s10 = sadd.s32 1, %s1202_s29 }
  0x12   : > { %s42_s11 = sadd.s32 1, %s1206_s30  ;;  %p40_p0 = scmp.ge.s32.totalorder %s38_s10, 4 }
  0x13   : > { %s176_s12 = sadd.s32 1, %s1190_s26  ;;  %p186_p1 = scmp.ne.s32.totalorder %s1190_s26, %s1186_s25 }
  0x14   : > { %p1315_p2 = scmp.eq.s32.totalorder %s891_s8, 7  ;;  %s1562_s10 = smov (%p40_p0, %s38_s10), 0 }
  0x15   : > { %1532 = sst [smem:[#allocation15_spill]] %s1562_s10  ;;  %s1564_s11 = smov (!%p40_p0, %s42_s11), %s1206_s30 }
  0x16   : > { %p1324_p3 = por %p1315_p2, %p186_p1  ;;  %p192_p4 = scmp.ne.s32.totalorder %s1186_s25, %s1182_s24 }
  0x17   : > { %p44_p5 = scmp.ge.s32.totalorder %s1564_s11, 2  ;;  %p1330_p6 = scmp.eq.s32.totalorder %s892_s9, 7 }
  0x18   : > { %s200_s16 = ssub.s32 %s1202_s29, %s1562_s10  ;;  %s206_s17 = sadd.s32 1, %s1178_s23 }
  0x19   : > { %s1566_s11 = smov (%p44_p5, %s1564_s11), 0  ;;  %p1341_p7 = por %p1330_p6, %p192_p4 }
  0x1a   : > { %1535 = sst [smem:[#allocation16_spill]] %s1566_s11  ;;  %p216_p8 = scmp.ne.s32.totalorder %s1178_s23, %s1174_s22 }
  0x1b   : > { %s1536_s18 = scalar_select %p1341_p7, 1, 0 }
  0x1c   : > { %s171_s19 = ssub.s32 %s1206_s30, %s1566_s11  ;;  %p222_p9 = scmp.ne.s32.totalorder %s1174_s22, %s1170_s21 }
  0x1d   : > { %p174_p10 = scmp.eq.s32.totalorder %s171_s19, 0  ;;  %s201_s20 = sor.u32 %s200_s16, %s171_s19 }
  0x1e   : > { %p204_p11 = scmp.eq.s32.totalorder %s201_s20, 0  ;;  %p1353_p12 = por %p216_p8, %p1315_p2 }
  0x1f   : > { %s1358_s9 = scalar_select %p174_p10, %s1190_s26, %s176_s12  }
  0x20   : > { %s1361_s10 = scalar_select %p204_p11, %s1178_s23, %s206_s17  }
  0x21   : > { %1538 = sst [smem:[#allocation17_spill]] %s1358_s9  ;;  %p1365_p13 = por %p222_p9, %p1330_p6 }
  0x22   : > { %p895_p0 = scmp.ge.s32.totalorder %s1210_s7, 1  ;;  %p272_p1 = scmp.lt.s32.totalorder %s1210_s7, 9 }
  0x23   : > { %s1539_s29 = scalar_select %p1365_p13, 1, 0 }
  0x24   : > { %p273_p4 = pnand %p895_p0, %p272_p1 }
  0x25   : > { %s1518_s13 = sand.u32 (!%p273_p4), 1, %s1186_s25   ;;  %p322_p2 = scmp.lt.s32.totalorder (!%p273_p4), %s1194_s27, 3 }
  0x26   : > { %276 = sbr.rel (%p273_p4) target bundleno = 1333 (0x535), region = 40  ;;  %s1375_s12 = sshll.u32 (!%p273_p4), %s1518_s13, 3 }
  0x27   : > { %p318_p5 = scmp.lt.s32.totalorder (!%p273_p4), %s1198_s28, 1  ;;  %s1540_s1 = sld [smem:[#allocation19_spill]] (!%p273_p4) }
  0x28   : > { %s1541_s0 = sld [smem:[#allocation18_spill]] (!%p273_p4)  ;;  %s1214_s30 = smov (!%p273_p4), 120  }
  0x29   : > { %s1542_s2 = sld [smem:[#allocation20_spill]] (!%p273_p4)  ;;  %p908_p6 = scmp.ne.s32.totalorder (!%p273_p4), %s1194_s27, 0 }
  0x2a   : > { %s1543_s3 = sld [smem:[#allocation21_spill]] (!%p273_p4) }
  0x2b   : > { %v1212_v0 = vmov 0.0   ;;  %vm1213_vm0 = vmmov 0   ;;  %s1381_s15 = scalar_select %p322_p2, %s1194_s27, 3  ;;  %vm350_vm1 = vcmask 261120   ;;  %vm425_vm2 = vcmask 64512  }
  0x2c   : > { %930 = vmatprep.subr.mxu0 %v1212_v0  ;;  %938 = vmatprep.mubr.msk.f32.mxu0 %vm1213_vm0, %v1212_v0  ;;  %s319_s16 = scalar_select %p318_p5, %s1198_s28, 1 }
  0x2d   : > { %941 = vmatprep.subr.mxu1 %v1212_v0  ;;  %943 = vmatprep.mubr.msk.f32.mxu1 %vm1213_vm0, %v1212_v0  ;;  %s918_s17 = sshll.u32 %s1381_s15, 5  ;;  %s1544_s4 = sld [smem:[#allocation22_spill]] (!%p908_p6) }
  0x2e   : > { %s326_s11 = scalar_lea.vmem %s1540_s1, %s918_s17  ;;  %s898_s13 = sshll.u32 %s319_s16, 3 }
  0x2f   : > { %v342_v1 = vld [vmem:[%s326_s11 + $0x18] sm:$0xff]  ;;  %v341_v2 = vld [vmem:[%s326_s11 + $0x10] sm:$0xff]  ;;  %v340_v3 = vld [vmem:[%s326_s11 + $0x8] sm:$0xff]  ;;  %s321_s26 = scalar_lea.vmem %s1541_s0, %s898_s13  ;;  %s329_s19 = scalar_lea.vmem %s1542_s2, %s1381_s15 }
  0x30   : > { %931 = vmatpush3.msra.mxu0 %v342_v1  ;;  %v339_v4 = vld [vmem:[%s326_s11] sm:$0xff]  ;;  %s901_s11 = sshll.u32 %s1381_s15, 3  ;;  %s1521_s16 = sand.u32 1, %s1174_s22  }
  0x31   : > { %932 = vmatprep.subr.mxu0 %v1212_v0  ;;  %v338_v5 = vld [vmem:[%s321_s26] sm:$0xff]  ;;  %s1215_s26 = smov 112   ;;  %s333_s20 = scalar_lea.vmem %s1543_s3, %s901_s11 }
  0x32   : > { %933 = vmatpush3.msra.mxu0 %v341_v2  ;;  %v902_v6 = vld [vmem:[%s329_s19] ss:$0 sm:$0xff]  ;;  %s1412_s17 = sshll.u32 %s1521_s16, 3  ;;  %s310_s19 = scalar_lea.vmem [#allocation6], %s1375_s12 }
  0x33   : > { %934 = vmatprep.subr.mxu0 %v1212_v0  ;;  %v603_v22 = vld [vmem:[%s333_s20] sm:$0xff]  ;;  %s1522_s15 = scalar_lea.vmem [#allocation8], %s1412_s17 }
  0x34   : > { %935 = vmatpush3.msra.mxu0 %v340_v3 }
  0x35   : > { %936 = vmatprep.subr.mxu0 %v1212_v0 }
  0x36   : > { %937 = vmatpush3.msra.mxu0 %v339_v4 }
  0x37   : > { %939 = vmatmul.mubr.msk.f32.vlgmr.msra.gmra.mxu0 %vm350_vm1, %v338_v5  ;;  %951 = vmatprep.subr.mxu0 %v1212_v0 }
  0x38   : > { %953 = vmatprep.mubr.msk.f32.mxu0 %vm1213_vm0, %v1212_v0  ;;  %952 = vmatpush3.msra.mxu0 %v603_v22 }
  0xf7   : > { %v420_v7 = vpop.f32.mrf.mxu0 }
  0xf8   : > { %v421_v8 = vadd.f32 %v902_v6, %v420_v7 }
  0xf9   : > { %v940_v9 = vpop.f32.mrf.mxu0 }
  0xfa   : > { %v424_v10 = vmul.f32 0.35355338, %v421_v8  ;;  %428 = vrot.lane.b32.xlu0 %v421_v8, %s1214_s30 }
  0xfc   : > { %426 = vst.msk [vmem:[#allocation2] sm:$0xff] %vm425_vm2, %v424_v10 }
 0x103   : > { %v438_v13 = vld [vmem:[#allocation2] sm:$0xff] }
 0x16c   : > { %v429_v11 = vpop.permute.xlu0 %428 }
 0x16d   : > { %431 = vst.msk [vmem:[#allocation3] sm:$0xff] %vm425_vm2, %v429_v11 }
 0x174   : > { %v439_v12 = vld [vmem:[#allocation3] sm:$0xff] }
 0x175   : > { %942 = vmatpush3.xpose.msk.msra.mxu1 %vm425_vm2, %v439_v12 }
 0x176   : > { %946 = vmatprep.subr.mxu1 %v1212_v0 }
 0x178   : > { %944 = vmatmul.mubr.msk.f32.vlgmr.msra.gmra.mxu1 %vm425_vm2, %v438_v13 }
 0x179   : > { %948 = vmatprep.mubr.msk.f32.mxu1 %vm1213_vm0, %v1212_v0 }
 0x238   : > { %v514_v14 = vpop.f32.mrf.mxu1 }
 0x239   : > { %v518_v15 = vsel %vm425_vm2, %v514_v14, -inf }
 0x23a   : > { %519 = vmax.xlane.f32.xlu0 %v518_v15  ;;  %v945_v16 = vpop.f32.mrf.mxu1 }
 0x2c3   : > { %v520_v17 = vpop.xlane.xlu0 %519 }
 0x2c4   : > { %v521_v18 = vsub.f32 %v514_v14, %v520_v17 }
 0x2c6   : > { %v522_v19 = vmul.f32 1.442695, %v521_v18 }
 0x2c8   : > { %1060 = vpow2.f32 %v522_v19 }
 0x2d5   : > { %v1061_v20 = vpop.eup %1060 }
 0x2d6   : > { %v524_v21 = vsel %vm425_vm2, %v1061_v20, 0.0 }
 0x2d7   : > { %525 = vadd.xlane.f32.xlu1 %v524_v21 }
 0x2e8   : > { %432 = vrot.lane.b32.xlu1 %v421_v8, %s1215_s26 }
 0x360   : > { %v526_v23 = vpop.xlane.xlu1 %525 }
 0x361   : > { %1062 = vrcp.f32 %v526_v23 }
 0x364   : > { %v433_v24 = vpop.permute.xlu1 %432 }
 0x365   : > { %435 = vst.msk [vmem:[#allocation4] sm:$0xff] %vm425_vm2, %v433_v24 }
 0x36c   : > { %v440_v25 = vld [vmem:[#allocation4] sm:$0xff] }
 0x36d   : > { %947 = vmatpush3.msra.mxu1 %v440_v25 }
 0x36e   : > { %v1063_v26 = vpop.eup %1062 }
 0x36f   : > { %v528_v27 = vmul.f32 %v1063_v26, %v1061_v20 }
 0x371   : > { %529 = vst.msk [vmem:[%s1522_s15] sm:$0xff] %vm425_vm2, %v528_v27  ;;  %949 = vmatmul.mubr.msk.f32.vlgmr.msra.gmra.mxu1 %vm425_vm2, %v528_v27 }
 0x431   : > { %v599_v28 = vpop.f32.mrf.mxu1 }
 0x432   : > { %954 = vmatmul.mubr.msk.f32.vlgmr.msra.gmra.mxu0 %vm425_vm2, %v599_v28 }
 0x433   : > { %v950_v29 = vpop.f32.mrf.mxu1 }
 0x4f0   : > { %680 = sbr.rel (%p908_p6) target bundleno = 1273 (0x4f9), region = 48 }
 0x4f2   : > { %v673_v30 = vpop.f32.mrf.mxu0 }
 0x4f4   : > { %v955_v31 = vpop.f32.mrf.mxu0 }
 0x4f5   : > { %v909_v32 = vld [vmem:[%s1544_s4] ss:$0 sm:$0xff] }
 0x4f6   : > { %v688_v33 = vadd.f32 %v909_v32, %v673_v30 }
 0x4f8   : > { %691 = vst.msk [vmem:[#allocation5] sm:$0xff] %vm350_vm1, %v688_v33 }
 0x4f9 PF: > { %p910_p8 = scmp.eq.s32.totalorder %s1194_s27, 0 }
 0x4fb   : > { %695 = sbr.rel (%p910_p8) target bundleno = 1284 (0x504), region = 52 }
 0x500   : > { %v697_v34 = vld [vmem:[#allocation5] sm:$0xff] }
 0x501   : > { %v698_v35 = vadd.f32 %v697_v34, %v673_v30 }
 0x503   : > { %700 = vst.msk [vmem:[#allocation5] sm:$0xff] %vm350_vm1, %v698_v35 }
 0x504 PF: > { %s913_s12 = sshll.u32 %s1198_s28, 7  ;;  %s725_s20 = sshll.u32 %s310_s19, 4  ;;  %s726_s20 = int_to_ptr.vmem [resolvable:$true] %s725_s20 }
 0x505   : > { %s723_s13 = scalar_lea.hbm %s1513_s5, %s913_s12  ;;  %s1545_s30 = sand.u32 1, %s1186_s25  }
 0x506   : > { %s706_s26 = scalar_lea.sflag [#allocation7], %s1545_s30  ;;  %s1064_s16 = scalar_lea.vmem %s726_s20, 128 }
 0x507   : > { %p1065_p9 = scmp.ne.s32.totalorder %s726_s20, %s1064_s16  ;;  %s1216_s15 = smov [#allocation6]  }
 0x508   : > { %s1068_s0 = sshll.u32 %s1216_s15, 4  ;;  %s1069_s0 = int_to_ptr.vmem [resolvable:$false] %s1068_s0 }
 0x509   : > { %p1066_p10 = pnand %p1065_p9, %p1324_p3  ;;  %s1070_s1 = scalar_lea.vmem %s1069_s0, 256 }
 0x50a   : > { %v702_v36 = vld [vmem:[#allocation5] sm:$0xff]  ;;  %p1071_p0 = scmp.lt.s32.totalorder %s726_s20, %s1069_s0  ;;  %p1072_p1 = scmp.lt.s32.totalorder %s1070_s1, %s1064_s16 }
 0x50b   : > { %704 = vst.msk [vmem:[%s310_s19] sm:$0xff] %vm350_vm1, %v702_v36  ;;  %p1067_p11 = pneg %p1066_p10 }
 0x50c   : > { %p1073_p4 = por %p1072_p1, %p1071_p0 }
 0x50e   : > { %p1074_p2 = pnand %p1073_p4, %p1067_p11 }
 0x510   : > { %1077 = shalt.err (!%p1074_p2)
}
 0x511   : > { %s1078_s11 = scalar_lea.hbm %s723_s13, 128  ;;  %s1082_s9 = scalar_lea.hbm %s1513_s5, 256 }
 0x512   : > { %p1079_p5 = scmp.ne.s32.totalorder %s723_s13, %s1078_s11  ;;  %p1083_p9 = scmp.lt.s32.totalorder %s723_s13, %s1513_s5 }
 0x513   : > { %p1084_p10 = scmp.lt.s32.totalorder %s1082_s9, %s1078_s11 }
 0x514   : > { %p1080_p6 = pnand %p1079_p5, %p1324_p3 }
 0x515   : > { %p1085_p13 = por %p1084_p10, %p1083_p9 }
 0x516   : > { %p1081_p8 = pneg %p1080_p6 }
 0x518   : > { %p1086_p7 = pnand %p1085_p13, %p1081_p8 }
 0x51a   : > { %1089 = shalt.err (!%p1086_p7)
}
 0x51b   : > { %956 = dma.vmem_to_hbm [thread:$0]  (%p1324_p3), %s726_s20, 128, %s723_s13, %s706_s26  }
 0x51c   : > { %s914_s0 = sshll.u32 %s1198_s28, 2  ;;  %s1546_s1 = scalar_lea.vmem [#allocation8], %s1412_s17 }
 0x51d   : > { %s741_s16 = sshll.u32 %s1546_s1, 4  ;;  %s737_s15 = sadd.s32 %s1194_s27, %s914_s0  ;;  %s742_s16 = int_to_ptr.vmem [resolvable:$true] %s741_s16 }
 0x51e   : > { %s915_s19 = sshll.u32 %s737_s15, 7  ;;  %s1547_s9 = sand.u32 1, %s1174_s22  }
 0x51f   : > { %s739_s11 = scalar_lea.hbm %s1514_s6, %s915_s19  ;;  %s711_s30 = scalar_lea.sflag [#allocation9], %s1547_s9 }
 0x520   : > { %s1090_s3 = scalar_lea.vmem %s742_s16, 128  ;;  %s1217_s14 = smov [#allocation8]  }
 0x521   : > { %p1091_p7 = scmp.ne.s32.totalorder %s742_s16, %s1090_s3  ;;  %s1094_s4 = sshll.u32 %s1217_s14, 4  ;;  %s1095_s4 = int_to_ptr.vmem [resolvable:$false] %s1094_s4 }
 0x522   : > { %s1096_s28 = scalar_lea.vmem %s1095_s4, 256  ;;  %p1097_p3 = scmp.lt.s32.totalorder %s742_s16, %s1095_s4 }
 0x523   : > { %p1092_p13 = pnand %p1091_p7, %p1353_p12  ;;  %p1098_p0 = scmp.lt.s32.totalorder %s1096_s28, %s1090_s3 }
 0x525   : > { %p1093_p11 = pneg %p1092_p13  ;;  %p1099_p1 = por %p1098_p0, %p1097_p3 }
 0x527   : > { %p1100_p4 = pnand %p1099_p1, %p1093_p11 }
 0x529   : > { %1103 = shalt.err (!%p1100_p4)
}
 0x52a   : > { %s1104_s27 = scalar_lea.hbm %s739_s11, 128  ;;  %s1108_s20 = scalar_lea.hbm %s1514_s6, 1024 }
 0x52b   : > { %p1105_p2 = scmp.ne.s32.totalorder %s739_s11, %s1104_s27  ;;  %p1109_p8 = scmp.lt.s32.totalorder %s739_s11, %s1514_s6 }
 0x52c   : > { %p1110_p9 = scmp.lt.s32.totalorder %s1108_s20, %s1104_s27 }
 0x52d   : > { %p1106_p5 = pnand %p1105_p2, %p1353_p12 }
 0x52e   : > { %p1111_p10 = por %p1110_p9, %p1109_p8 }
 0x52f   : > { %p1107_p6 = pneg %p1106_p5 }
 0x531   : > { %p1112_p7 = pnand %p1111_p10, %p1107_p6 }
 0x533   : > { %1115 = shalt.err (!%p1112_p7)
}
 0x534   : > { %957 = dma.vmem_to_hbm [thread:$0]  (%p1353_p12), %s742_s16, 128, %s739_s11, %s711_s30  }
 0x535 PF: > { %p967_p13 = scmp.ge.s32.totalorder %s1210_s7, 2  ;;  %s753_s3 = sand.u32 1, %s1182_s24  }
 0x536   : > { %p1548_p11 = scmp.ne.s32.totalorder %s1536_s18, 0  ;;  %s754_s4 = scalar_lea.sflag [#allocation7], %s753_s3 }
 0x538   : > { %p961_p3 = pnand %p967_p13, %p1548_p11 }
 0x53a   : > { %p962_p0 = pneg %p961_p3 }
 0x53c   : > { %1161 = dma.done.wait (%p962_p0), %s754_s4, 128  }
 0x53d   : > { %1163 = vsyncadd (%p962_p0), %s754_s4, 4294967168  ;;  %s762_s1 = sand.u32 1, %s1170_s21   ;;  %p1549_p1 = scmp.ne.s32.totalorder %s1539_s29, 0 }
 0x53e   : > { %s763_s8 = scalar_lea.sflag [#allocation9], %s762_s1 }
 0x53f   : > { %p964_p4 = pnand %p967_p13, %p1549_p1 }
 0x541   : > { %p965_p2 = pneg %p964_p4 }
 0x543   : > { %1165 = dma.done.wait (%p965_p2), %s763_s8, 128  }
 0x544   : > { %1167 = vsyncadd (%p965_p2), %s763_s8, 4294967168  ;;  %s23_s7 = sadd.s32 1, %s1210_s7   ;;  %s1550_s18 = sld [smem:[#allocation12_spill]] }
 0x545   : > { %p20_p12 = scmp.ge.s32.totalorder %s23_s7, 10   ;;  %s1551_s26 = sld [smem:[#allocation17_spill]] }
 0x546   : > { %s1552_s27 = sld [smem:[#allocation13_spill]]  ;;  %s1556_s21 = smov %s1174_s22 }
 0x547   : > { %s1553_s28 = sld [smem:[#allocation14_spill]]  ;;  %s1557_s22 = smov %s1178_s23 }
 0x548   : > { %s1554_s29 = sld [smem:[#allocation15_spill]]  ;;  %s1558_s23 = smov %s1361_s10 }
 0x549   : > { %s1555_s30 = sld [smem:[#allocation16_spill]]  ;;  %s1559_s24 = smov %s1186_s25 }
 0x54a   : > { %s1560_s25 = smov %s1550_s18  ;;  %22 = sbr.rel (!%p20_p12) target bundleno = 15 (0xf), region = 117 }
 0x54f   :  { %768 = vsyncpa [#allocation7], 1 }
 0x550   :  { %770 = vsyncpa [#allocation7 + $0x1], 1 }
 0x551   :  { %771 = vsyncpa [#allocation9], 1 }
 0x552   :  { %773 = vsyncpa [#allocation9 + $0x1], 1 }

</bundles_post_ra>
